<compile_context>
chip_gen: v6e
topology: v6e:2x2x1
jax: 0.10.0
libtpu: 0.0.40
codegen_flags: <defaults>
</compile_context>

<pallas_src>
from functools import partial

import jax
import jax.numpy as jnp
from jax import lax
from jax.experimental import pallas as pl
from jax.experimental.pallas import tpu as pltpu


def _convmlp_kernel(x_ref, w1_ref, b1_ref, w2t_ref, b2_ref, o_ref, acc_ref,
                    *, nb, th, n_chunks):
    # x_ref  : (nb, C_in, TP)       activations, pixels on the lane axis
    # w1_ref : (C_hid_pad, C_in)    fc1 weight (torch layout, hidden on sublanes)
    # b1_ref : (C_hid_pad, 1)       f32
    # w2t_ref: (C_hid_pad, C_out)   fc2 weight, transposed (hidden on sublanes)
    # b2_ref : (C_out, 1)           f32
    # o_ref  : (nb, C_out, TP)
    # acc_ref: (C_out, TP)          f32 scratch accumulator
    for i in range(nb):                          # tiny static unroll over images in the block
        x = x_ref[i]                             # (C_in, TP)
        acc_ref[...] = jnp.zeros_like(acc_ref)

        def do_chunk(s):
            h = jnp.dot(w1_ref[pl.ds(s, th), :], x,
                        preferred_element_type=jnp.float32)
            h = jnp.maximum(h + b1_ref[pl.ds(s, th), :], 0.0)   # bias + ReLU in f32 (VPU filler)
            # NOTE: for bf16 activations this truncates the hidden to bf16 before the
            # second MXU matmul (accumulation stays f32).  Exact for f32 activations.
            h = h.astype(w2t_ref.dtype)
            acc_ref[...] += lax.dot_general(
                w2t_ref[pl.ds(s, th), :], h,
                dimension_numbers=(((0,), (0,)), ((), ())),      # contract hidden (dim 0 of both)
                preferred_element_type=jnp.float32)

        if n_chunks == 1:
            do_chunk(0)
        else:
            # Rolled loop bounds the live hidden intermediate to a single chunk.
            lax.fori_loop(
                0, n_chunks,
                lambda c, carry: (do_chunk(pl.multiple_of(c * th, th)), carry)[1],
                0)

        o_ref[i] = (acc_ref[...] + b2_ref[...]).astype(o_ref.dtype)


def _vmem_capacity_bytes():
    try:
        info = pltpu.get_tpu_info()
        cap = getattr(info, "vmem_capacity_bytes", None)
        if cap:
            return int(cap)
    except Exception:
        pass
    return 64 * 2 ** 20  # conservative default (v7x per-TensorCore)


def conv_mlp(x_nchw, w1, b1, w2, b2, *, tp=None):
    """ConvMlp forward. x_nchw: (N, C_in, H, W); w1: (C_hid, C_in, 1, 1); w2: (C_out, C_hid, 1, 1)."""
    N, C_in, H, W = x_nchw.shape
    C_hid = w1.shape[0]
    C_out = w2.shape[0]
    P = H * W

    dsize = jnp.dtype(x_nchw.dtype).itemsize
    vmem_cap = _vmem_capacity_bytes()

    # --- pixel tile: generation-aware default, clamped to the image, 128-aligned ---
    if tp is None:
        tp = 1024 if vmem_cap >= 96 * 2 ** 20 else 512
    tp = int(max(128, min(int(tp), pl.cdiv(P, 128) * 128)))
    # v7x megacore: when N == 1, split the pixel axis so both TensorCores get work.
    if N == 1 and pl.cdiv(P, tp) < 2 and P > 128:
        tp = int(max(128, pl.cdiv(pl.cdiv(P, 2), 128) * 128))
    num_p = pl.cdiv(P, tp)

    # --- small-channel regime: fold several images into one grid step ---
    step_bytes_per_img = (C_in + C_out) * tp * dsize
    nb = 1
    if step_bytes_per_img < (512 << 10):
        nb = int(min(N, max(1, (512 << 10) // max(step_bytes_per_img, 1))))
        while nb > 1 and pl.cdiv(N, nb) * num_p < 2:  # keep >=2 grid steps for megacore
            nb = max(1, nb // 2)
    num_n = pl.cdiv(N, nb)

    # --- hidden-dim chunking (pad C_hid so chunks tile it exactly) ---
    if C_hid > 512:
        C_hid_pad = pl.cdiv(C_hid, 128) * 128
        th = next(t for t in (512, 384, 256, 128) if C_hid_pad % t == 0)
    else:
        C_hid_pad = pl.cdiv(C_hid, 8) * 8
        th = C_hid_pad
    n_chunks = C_hid_pad // th

    # --- parameter prep: 1x1 conv == per-pixel matmul; cast weights to activation dtype ---
    # TODO(synk): for v5e, optionally pad C_in/C_out to multiples of 128 as well (ragged
    # K/M wastes MXU cycles there); omitted since it adds HBM traffic on v6e/v7x.
    wdt = x_nchw.dtype
    w1_m = w1[:, :, 0, 0].astype(wdt)                    # (C_hid, C_in)
    w2t_m = jnp.transpose(w2[:, :, 0, 0]).astype(wdt)    # (C_hid, C_out), one-time tiny transpose
    b1_m = b1.reshape(C_hid, 1).astype(jnp.float32)
    b2_m = b2.reshape(C_out, 1).astype(jnp.float32)
    if C_hid_pad != C_hid:
        pad = C_hid_pad - C_hid                          # zero rows -> zero contribution
        w1_m = jnp.pad(w1_m, ((0, pad), (0, 0)))
        w2t_m = jnp.pad(w2t_m, ((0, pad), (0, 0)))
        b1_m = jnp.pad(b1_m, ((0, pad), (0, 0)))

    x_flat = x_nchw.reshape(N, C_in, P)                  # free, contiguous reshape (stays NCHW)

    wsize = jnp.dtype(wdt).itemsize
    vmem_bytes = (
        2 * nb * (C_in + C_out) * tp * dsize             # double-buffered activation tiles (in+out)
        + C_hid_pad * (C_in + C_out) * wsize             # single-buffered weights
        + (C_hid_pad + C_out) * 4                        # biases (f32)
        + th * tp * (4 + wsize)                          # one f32 hidden chunk + its cast copy
        + C_out * tp * 4                                 # f32 accumulator scratch
    )
    vmem_limit = int(min(int(0.8 * vmem_cap), max(16 << 20, int(1.5 * vmem_bytes))))

    cost = pl.CostEstimate(
        flops=2 * N * P * (C_in * C_hid + C_hid * C_out),
        transcendentals=0,
        bytes_accessed=(N * P * (C_in + C_out) * dsize
                        + C_hid_pad * (C_in + C_out) * wsize
                        + (C_hid_pad + C_out) * 4),
    )

    kernel = partial(_convmlp_kernel, nb=nb, th=th, n_chunks=n_chunks)
    grid = (num_p, num_n)

    def build(single_buffer_consts):
        def const_spec(shape):
            if single_buffer_consts:
                return pl.BlockSpec(shape, lambda p, n: (0, 0),
                                    pipeline_mode=pl.Buffered(1))
            return pl.BlockSpec(shape, lambda p, n: (0, 0))

        return pl.pallas_call(
            kernel,
            out_shape=jax.ShapeDtypeStruct((N, C_out, P), x_nchw.dtype),
            grid_spec=pltpu.PrefetchScalarGridSpec(
                num_scalar_prefetch=0,
                grid=grid,
                in_specs=[
                    pl.BlockSpec((nb, C_in, tp), lambda p, n: (n, 0, p)),
                    const_spec((C_hid_pad, C_in)),
                    const_spec((C_hid_pad, 1)),
                    const_spec((C_hid_pad, C_out)),
                    const_spec((C_out, 1)),
                ],
                out_specs=pl.BlockSpec((nb, C_out, tp), lambda p, n: (n, 0, p)),
                scratch_shapes=[pltpu.VMEM((C_out, tp), jnp.float32)],
            ),
            compiler_params=pltpu.CompilerParams(
                dimension_semantics=("parallel", "parallel"),
                vmem_limit_bytes=vmem_limit,
            ),
            cost_estimate=cost,
        )

    try:
        out_flat = build(True)(x_flat, w1_m, b1_m, w2t_m, b2_m)
    except Exception:
        # Fallback if pl.Buffered(1) is rejected by this jax/Mosaic version; the only
        # cost is double-buffered (still grid-resident) constant operands.
        out_flat = build(False)(x_flat, w1_m, b1_m, w2t_m, b2_m)

    # (N, C_out, H*W) -> (N, C_out, H, W): free reshape, already NCHW.
    return out_flat.reshape(N, C_out, H, W)


if __name__ == "__main__":
    # Small shapes consistent with ConvMlp: in_features=4, hidden=8, out=4
    N, C_in, H, W = 2, 4, 16, 16
    C_hid, C_out = 8, 4

    key = jax.random.PRNGKey(0)
    kx, k1, kb1, k2, kb2 = jax.random.split(key, 5)

    x = jax.random.normal(kx, (N, C_in, H, W), dtype=jnp.float32)
    # torch Conv2d weight layout: (out_channels, in_channels, 1, 1)
    w1 = jax.random.normal(k1, (C_hid, C_in, 1, 1), dtype=jnp.float32) * 0.1
    b1 = jax.random.normal(kb1, (C_hid,), dtype=jnp.float32) * 0.1
    w2 = jax.random.normal(k2, (C_out, C_hid, 1, 1), dtype=jnp.float32) * 0.1
    b2 = jax.random.normal(kb2, (C_out,), dtype=jnp.float32) * 0.1

    out = conv_mlp(x, w1, b1, w2, b2)
    out = jax.block_until_ready(out)

    # Pure-JAX reference (per-pixel MLP semantics of two 1x1 convs + ReLU)
    xr = x.reshape(N, C_in, H * W)
    h_ref = jnp.maximum(
        jnp.einsum("hc,ncp->nhp", w1[:, :, 0, 0], xr) + b1[None, :, None], 0.0)
    y_ref = jnp.einsum("oh,nhp->nop", w2[:, :, 0, 0], h_ref) + b2[None, :, None]
    y_ref = y_ref.reshape(N, C_out, H, W)

    assert out.shape == (N, C_out, H, W)
    assert jnp.allclose(out, y_ref, atol=1e-5, rtol=1e-5)
    print("KERNEL_OK")
</pallas_src>

<mosaic_0001>
module attributes {stable_mosaic.version = 11 : i64} {
  func.func @_convmlp_kernel(%arg0: i32, %arg1: i32, %arg2: memref<1x4x256xf32, #tpu.memory_space<vmem>>, %arg3: memref<8x4xf32, #tpu.memory_space<vmem>>, %arg4: memref<8x1xf32, #tpu.memory_space<vmem>>, %arg5: memref<8x4xf32, #tpu.memory_space<vmem>>, %arg6: memref<4x1xf32, #tpu.memory_space<vmem>>, %arg7: memref<1x4x256xf32, #tpu.memory_space<vmem>>, %arg8: memref<4x256xf32, #tpu.memory_space<vmem>>) attributes {dimension_semantics = [#tpu.dimension_semantics<parallel>, #tpu.dimension_semantics<parallel>], iteration_bounds = array<i64: 1, 2>, scalar_prefetch = 0 : i64, scratch_operands = 1 : i64, tpu.core_type = #tpu.core_type<tc>, window_params = [{transform_indices = @transform_0, window_bounds = array<i64: 1, 4, 256>}, {pipeline_mode = #tpu.pipeline_mode<synchronous>, transform_indices = @transform_1, window_bounds = array<i64: 8, 4>}, {pipeline_mode = #tpu.pipeline_mode<synchronous>, transform_indices = @transform_2, window_bounds = array<i64: 8, 1>}, {pipeline_mode = #tpu.pipeline_mode<synchronous>, transform_indices = @transform_3, window_bounds = array<i64: 8, 4>}, {pipeline_mode = #tpu.pipeline_mode<synchronous>, transform_indices = @transform_4, window_bounds = array<i64: 4, 1>}, {transform_indices = @transform_5, window_bounds = array<i64: 1, 4, 256>}]} {
    %c0 = arith.constant 0 : index
    %c0_0 = arith.constant 0 : index
    %c0_1 = arith.constant 0 : index
    %0 = vector.load %arg2[%c0, %c0_0, %c0_1] : memref<1x4x256xf32, #tpu.memory_space<vmem>>, vector<1x4x256xf32>
    %1 = vector.shape_cast %0 : vector<1x4x256xf32> to vector<4x256xf32>
    %cst = arith.constant 0.000000e+00 : f32
    %2 = vector.broadcast %cst : f32 to vector<4x256xf32>
    %c0_2 = arith.constant 0 : index
    %c0_3 = arith.constant 0 : index
    %3 = vector.load %arg8[%c0_2, %c0_3] : memref<4x256xf32, #tpu.memory_space<vmem>>, vector<4x256xf32>
    tpu.vector_store %arg8[%c0_2, %c0_3], %2 {strides = array<i32>} : memref<4x256xf32, #tpu.memory_space<vmem>>, vector<4x256xf32>,
    %c0_4 = arith.constant 0 : index
    %c0_5 = arith.constant 0 : index
    %4 = vector.load %arg3[%c0_4, %c0_5] : memref<8x4xf32, #tpu.memory_space<vmem>>, vector<8x4xf32>
    %cst_6 = arith.constant dense<0.000000e+00> : vector<8x256xf32>
    %5 = tpu.matmul %4, %1, %cst_6 {dimension_numbers = #tpu.dot_dimension_numbers<[1], [0], [0], [1], [0, 0, 1, 1], [], []>} : vector<8x4xf32>, vector<4x256xf32>, vector<8x256xf32> -> vector<8x256xf32>
    %c0_7 = arith.constant 0 : index
    %c0_8 = arith.constant 0 : index
    %6 = vector.load %arg4[%c0_7, %c0_8] : memref<8x1xf32, #tpu.memory_space<vmem>>, vector<8x1xf32>
    %7 = vector.broadcast %6 : vector<8x1xf32> to vector<8x256xf32>
    %8 = arith.addf %5, %7 : vector<8x256xf32>
    %cst_9 = arith.constant 0.000000e+00 : f32
    %9 = vector.broadcast %cst_9 : f32 to vector<8x256xf32>
    %10 = arith.maximumf %8, %9 : vector<8x256xf32>
    %c0_10 = arith.constant 0 : index
    %c0_11 = arith.constant 0 : index
    %11 = vector.load %arg8[%c0_10, %c0_11] : memref<4x256xf32, #tpu.memory_space<vmem>>, vector<4x256xf32>
    %c0_12 = arith.constant 0 : index
    %c0_13 = arith.constant 0 : index
    %12 = vector.load %arg5[%c0_12, %c0_13] : memref<8x4xf32, #tpu.memory_space<vmem>>, vector<8x4xf32>
    %cst_14 = arith.constant dense<0.000000e+00> : vector<4x256xf32>
    %13 = tpu.matmul %12, %10, %cst_14 {dimension_numbers = #tpu.dot_dimension_numbers<[0], [0], [1], [1], [0, 1, 1, 1], [], []>} : vector<8x4xf32>, vector<8x256xf32>, vector<4x256xf32> -> vector<4x256xf32>
    %14 = arith.addf %11, %13 : vector<4x256xf32>
    %c0_15 = arith.constant 0 : index
    %c0_16 = arith.constant 0 : index
    %15 = vector.load %arg8[%c0_15, %c0_16] : memref<4x256xf32, #tpu.memory_space<vmem>>, vector<4x256xf32>
    tpu.vector_store %arg8[%c0_15, %c0_16], %14 {strides = array<i32>} : memref<4x256xf32, #tpu.memory_space<vmem>>, vector<4x256xf32>,
    %c0_17 = arith.constant 0 : index
    %c0_18 = arith.constant 0 : index
    %16 = vector.load %arg8[%c0_17, %c0_18] : memref<4x256xf32, #tpu.memory_space<vmem>>, vector<4x256xf32>
    %c0_19 = arith.constant 0 : index
    %c0_20 = arith.constant 0 : index
    %17 = vector.load %arg6[%c0_19, %c0_20] : memref<4x1xf32, #tpu.memory_space<vmem>>, vector<4x1xf32>
    %18 = vector.broadcast %17 : vector<4x1xf32> to vector<4x256xf32>
    %19 = arith.addf %16, %18 : vector<4x256xf32>
    %c0_21 = arith.constant 0 : index
    %c0_22 = arith.constant 0 : index
    %c0_23 = arith.constant 0 : index
    %20 = vector.load %arg7[%c0_21, %c0_22, %c0_23] : memref<1x4x256xf32, #tpu.memory_space<vmem>>, vector<1x4x256xf32>
    %21 = vector.shape_cast %20 : vector<1x4x256xf32> to vector<4x256xf32>
    %22 = vector.shape_cast %19 : vector<4x256xf32> to vector<1x4x256xf32>
    tpu.vector_store %arg7[%c0_21, %c0_22, %c0_23], %22 {strides = array<i32>} : memref<1x4x256xf32, #tpu.memory_space<vmem>>, vector<1x4x256xf32>,
    return
  }
  func.func @transform_0(%arg0: i32, %arg1: i32) -> (i32, i32, i32) {
    %c0_i32 = arith.constant 0 : i32
    %c0_i32_0 = arith.constant 0 : i32
    return %arg1, %c0_i32, %arg0 : i32, i32, i32
  }
  func.func @transform_1(%arg0: i32, %arg1: i32) -> (i32, i32) {
    %c0_i32 = arith.constant 0 : i32
    %c0_i32_0 = arith.constant 0 : i32
    %c0_i32_1 = arith.constant 0 : i32
    return %c0_i32, %c0_i32_0 : i32, i32
  }
  func.func @transform_2(%arg0: i32, %arg1: i32) -> (i32, i32) {
    %c0_i32 = arith.constant 0 : i32
    %c0_i32_0 = arith.constant 0 : i32
    %c0_i32_1 = arith.constant 0 : i32
    return %c0_i32, %c0_i32_0 : i32, i32
  }
  func.func @transform_3(%arg0: i32, %arg1: i32) -> (i32, i32) {
    %c0_i32 = arith.constant 0 : i32
    %c0_i32_0 = arith.constant 0 : i32
    %c0_i32_1 = arith.constant 0 : i32
    return %c0_i32, %c0_i32_0 : i32, i32
  }
  func.func @transform_4(%arg0: i32, %arg1: i32) -> (i32, i32) {
    %c0_i32 = arith.constant 0 : i32
    %c0_i32_0 = arith.constant 0 : i32
    %c0_i32_1 = arith.constant 0 : i32
    return %c0_i32, %c0_i32_0 : i32, i32
  }
  func.func @transform_5(%arg0: i32, %arg1: i32) -> (i32, i32, i32) {
    %c0_i32 = arith.constant 0 : i32
    %c0_i32_0 = arith.constant 0 : i32
    return %arg1, %c0_i32, %arg0 : i32, i32, i32
  }
}

module attributes {stable_mosaic.version = 11 : i64} {
  func.func @_convmlp_kernel(%arg0: i32, %arg1: i32, %arg2: memref<1x4x256xf32, #tpu.memory_space<vmem>>, %arg3: memref<8x4xf32, #tpu.memory_space<vmem>>, %arg4: memref<8x1xf32, #tpu.memory_space<vmem>>, %arg5: memref<8x4xf32, #tpu.memory_space<vmem>>, %arg6: memref<4x1xf32, #tpu.memory_space<vmem>>, %arg7: memref<1x4x256xf32, #tpu.memory_space<vmem>>, %arg8: memref<4x256xf32, #tpu.memory_space<vmem>>) attributes {dimension_semantics = [#tpu.dimension_semantics<parallel>, #tpu.dimension_semantics<parallel>], iteration_bounds = array<i64: 1, 2>, scalar_prefetch = 0 : i64, scratch_operands = 1 : i64, tpu.core_type = #tpu.core_type<tc>, window_params = [{transform_indices = @transform_0, window_bounds = array<i64: 1, 4, 256>}, {pipeline_mode = #tpu.pipeline_mode<synchronous>, transform_indices = @transform_1, window_bounds = array<i64: 8, 4>}, {pipeline_mode = #tpu.pipeline_mode<synchronous>, transform_indices = @transform_2, window_bounds = array<i64: 8, 1>}, {pipeline_mode = #tpu.pipeline_mode<synchronous>, transform_indices = @transform_3, window_bounds = array<i64: 8, 4>}, {pipeline_mode = #tpu.pipeline_mode<synchronous>, transform_indices = @transform_4, window_bounds = array<i64: 4, 1>}, {transform_indices = @transform_5, window_bounds = array<i64: 1, 4, 256>}]} {
    %c0 = arith.constant 0 : index
    %c0_0 = arith.constant 0 : index
    %c0_1 = arith.constant 0 : index
    %0 = vector.load %arg2[%c0, %c0_0, %c0_1] : memref<1x4x256xf32, #tpu.memory_space<vmem>>, vector<1x4x256xf32>
    %1 = vector.shape_cast %0 : vector<1x4x256xf32> to vector<4x256xf32>
    %cst = arith.constant 0.000000e+00 : f32
    %2 = vector.broadcast %cst : f32 to vector<4x256xf32>
    %c0_2 = arith.constant 0 : index
    %c0_3 = arith.constant 0 : index
    %3 = vector.load %arg8[%c0_2, %c0_3] : memref<4x256xf32, #tpu.memory_space<vmem>>, vector<4x256xf32>
    tpu.vector_store %arg8[%c0_2, %c0_3], %2 {strides = array<i32>} : memref<4x256xf32, #tpu.memory_space<vmem>>, vector<4x256xf32>,
    %c0_4 = arith.constant 0 : index
    %c0_5 = arith.constant 0 : index
    %4 = vector.load %arg3[%c0_4, %c0_5] : memref<8x4xf32, #tpu.memory_space<vmem>>, vector<8x4xf32>
    %cst_6 = arith.constant dense<0.000000e+00> : vector<8x256xf32>
    %5 = tpu.matmul %4, %1, %cst_6 {dimension_numbers = #tpu.dot_dimension_numbers<[1], [0], [0], [1], [0, 0, 1, 1], [], []>} : vector<8x4xf32>, vector<4x256xf32>, vector<8x256xf32> -> vector<8x256xf32>
    %c0_7 = arith.constant 0 : index
    %c0_8 = arith.constant 0 : index
    %6 = vector.load %arg4[%c0_7, %c0_8] : memref<8x1xf32, #tpu.memory_space<vmem>>, vector<8x1xf32>
    %7 = vector.broadcast %6 : vector<8x1xf32> to vector<8x256xf32>
    %8 = arith.addf %5, %7 : vector<8x256xf32>
    %cst_9 = arith.constant 0.000000e+00 : f32
    %9 = vector.broadcast %cst_9 : f32 to vector<8x256xf32>
    %10 = arith.maximumf %8, %9 : vector<8x256xf32>
    %c0_10 = arith.constant 0 : index
    %c0_11 = arith.constant 0 : index
    %11 = vector.load %arg8[%c0_10, %c0_11] : memref<4x256xf32, #tpu.memory_space<vmem>>, vector<4x256xf32>
    %c0_12 = arith.constant 0 : index
    %c0_13 = arith.constant 0 : index
    %12 = vector.load %arg5[%c0_12, %c0_13] : memref<8x4xf32, #tpu.memory_space<vmem>>, vector<8x4xf32>
    %cst_14 = arith.constant dense<0.000000e+00> : vector<4x256xf32>
    %13 = tpu.matmul %12, %10, %cst_14 {dimension_numbers = #tpu.dot_dimension_numbers<[0], [0], [1], [1], [0, 1, 1, 1], [], []>} : vector<8x4xf32>, vector<8x256xf32>, vector<4x256xf32> -> vector<4x256xf32>
    %14 = arith.addf %11, %13 : vector<4x256xf32>
    %c0_15 = arith.constant 0 : index
    %c0_16 = arith.constant 0 : index
    %15 = vector.load %arg8[%c0_15, %c0_16] : memref<4x256xf32, #tpu.memory_space<vmem>>, vector<4x256xf32>
    tpu.vector_store %arg8[%c0_15, %c0_16], %14 {strides = array<i32>} : memref<4x256xf32, #tpu.memory_space<vmem>>, vector<4x256xf32>,
    %c0_17 = arith.constant 0 : index
    %c0_18 = arith.constant 0 : index
    %16 = vector.load %arg8[%c0_17, %c0_18] : memref<4x256xf32, #tpu.memory_space<vmem>>, vector<4x256xf32>
    %c0_19 = arith.constant 0 : index
    %c0_20 = arith.constant 0 : index
    %17 = vector.load %arg6[%c0_19, %c0_20] : memref<4x1xf32, #tpu.memory_space<vmem>>, vector<4x1xf32>
    %18 = vector.broadcast %17 : vector<4x1xf32> to vector<4x256xf32>
    %19 = arith.addf %16, %18 : vector<4x256xf32>
    %c0_21 = arith.constant 0 : index
    %c0_22 = arith.constant 0 : index
    %c0_23 = arith.constant 0 : index
    %20 = vector.load %arg7[%c0_21, %c0_22, %c0_23] : memref<1x4x256xf32, #tpu.memory_space<vmem>>, vector<1x4x256xf32>
    %21 = vector.shape_cast %20 : vector<1x4x256xf32> to vector<4x256xf32>
    %22 = vector.shape_cast %19 : vector<4x256xf32> to vector<1x4x256xf32>
    tpu.vector_store %arg7[%c0_21, %c0_22, %c0_23], %22 {strides = array<i32>} : memref<1x4x256xf32, #tpu.memory_space<vmem>>, vector<1x4x256xf32>,
    return
  }
  func.func @transform_0(%arg0: i32, %arg1: i32) -> (i32, i32, i32) {
    %c0_i32 = arith.constant 0 : i32
    %c0_i32_0 = arith.constant 0 : i32
    return %arg1, %c0_i32, %arg0 : i32, i32, i32
  }
  func.func @transform_1(%arg0: i32, %arg1: i32) -> (i32, i32) {
    %c0_i32 = arith.constant 0 : i32
    %c0_i32_0 = arith.constant 0 : i32
    %c0_i32_1 = arith.constant 0 : i32
    return %c0_i32, %c0_i32_0 : i32, i32
  }
  func.func @transform_2(%arg0: i32, %arg1: i32) -> (i32, i32) {
    %c0_i32 = arith.constant 0 : i32
    %c0_i32_0 = arith.constant 0 : i32
    %c0_i32_1 = arith.constant 0 : i32
    return %c0_i32, %c0_i32_0 : i32, i32
  }
  func.func @transform_3(%arg0: i32, %arg1: i32) -> (i32, i32) {
    %c0_i32 = arith.constant 0 : i32
    %c0_i32_0 = arith.constant 0 : i32
    %c0_i32_1 = arith.constant 0 : i32
    return %c0_i32, %c0_i32_0 : i32, i32
  }
  func.func @transform_4(%arg0: i32, %arg1: i32) -> (i32, i32) {
    %c0_i32 = arith.constant 0 : i32
    %c0_i32_0 = arith.constant 0 : i32
    %c0_i32_1 = arith.constant 0 : i32
    return %c0_i32, %c0_i32_0 : i32, i32
  }
  func.func @transform_5(%arg0: i32, %arg1: i32) -> (i32, i32, i32) {
    %c0_i32 = arith.constant 0 : i32
    %c0_i32_0 = arith.constant 0 : i32
    return %arg1, %c0_i32, %arg0 : i32, i32, i32
  }
}

</mosaic_0001>

<bundles_post_ra>
// kernel: tpu_custom_call.1
= control target key start
LH: loop header
LB: loop body
LE: loop exit
PB: predicated region body
PF: predicated region fallthrough
CT: control target
= control target key end

     0   :  { %10 = vsyncpa [#allocation4], 0  ;;  %s874_s0 = inlined_call_operand.vmem [shape: f32[2,4,256], index: 0, kind: input, shape index: {}]   ;;  %s875_s1 = inlined_call_operand.vmem [shape: f32[8,4], index: 1, kind: input, shape index: {}]   ;;  %s876_s2 = inlined_call_operand.vmem [shape: f32[8,1], index: 2, kind: input, shape index: {}]   ;;  %s877_s3 = inlined_call_operand.vmem [shape: f32[8,4], index: 3, kind: input, shape index: {}]   ;;  %s878_s4 = inlined_call_operand.vmem [shape: f32[4,1], index: 4, kind: input, shape index: {}]   ;;  %s879_s5 = inlined_call_operand.hbm [shape: f32[2,4,256], index: 5, kind: output, shape index: {}]  }
   0x1   :  { %12 = vsyncpa [#allocation4 + $0x1], 0  ;;  %s763_s18 = smov 0   ;;  %s765_s19 = smov 0  }
   0x2   :  { %s767_s20 = smov 0   ;;  %s769_s21 = smov 0  }
   0x3   :  { %s771_s22 = smov 0   ;;  %s773_s23 = smov 0  }
   0x4 LB: > { %s571_s24 = sadd.s32 4294967295, %s727_s23   ;;  %s572_s25 = sadd.s32 4294967294, %s727_s23   ;;  %s727_s23 = sphi %s773_s23, %s18_s23   ;;  %s723_s22 = sphi %s771_s22, %s886_s22   ;;  %s719_s21 = sphi %s769_s21, %s885_s21   ;;  %s715_s20 = sphi %s767_s20, %s884_s20   ;;  %s711_s19 = sphi %s765_s19, %s883_s19   ;;  %s707_s18 = sphi %s763_s18, %s882_s18  }
   0x5   : > { %s27_s26 = sadd.s32 1, %s723_s22  ;;  %s151_s27 = sadd.s32 1, %s715_s20 }
   0x6   : > { %p28_p0 = scmp.ge.s32.totalorder %s27_s26, 2  ;;  %p161_p1 = scmp.ne.s32.totalorder %s715_s20, %s711_s19 }
   0x7   : > { %p162_p2 = scmp.eq.s32.totalorder %s571_s24, 1  ;;  %p167_p3 = scmp.ne.s32.totalorder %s711_s19, %s707_s18 }
   0x8   : > { %s888_s26 = smov (%p28_p0, %s27_s26), 0  ;;  %p168_p5 = scmp.eq.s32.totalorder %s572_s25, 1 }
   0x9   : > { %p803_p4 = por %p162_p2, %p161_p1  ;;  %s146_s29 = ssub.s32 %s723_s22, %s888_s26 }
   0xa   : > { %p575_p6 = scmp.ge.s32.totalorder %s727_s23, 1  ;;  %p149_p7 = scmp.eq.s32.totalorder %s146_s29, 0 }
   0xb   : > { %p810_p8 = por %p168_p5, %p167_p3  ;;  %p211_p9 = scmp.lt.s32.totalorder %s727_s23, 3 }
   0xc   : > { %s816_s6 = scalar_select %p149_p7, %s715_s20, %s151_s27  }
   0xd   : > { %p212_p10 = pnand %p575_p6, %p211_p9 }
   0xe   : > { %p244_p11 = scmp.lt.s32.totalorder (!%p212_p10), %s719_s21, 1  ;;  %s240_s27 = sand.u32 (!%p212_p10), 1, %s711_s19  }
   0xf   : > { %215 = sbr.rel (%p212_p10) target bundleno = 442 (0x1ba), region = 40  ;;  %s576_s29 = sshll.u32 (!%p212_p10), %s240_s27, 3 }
  0x10   : > { %s589_s7 = sshll.u32 (!%p212_p10), %s719_s21, 7  ;;  %s242_s8 = scalar_lea.vmem (!%p212_p10), [#allocation3], %s576_s29 }
  0x11   : > { %s493_s12 = scalar_lea.hbm (!%p212_p10), %s879_s5, %s589_s7  ;;  %s732_s15 = smov (!%p212_p10), [#allocation3]  }
  0x12   : > { %s655_s16 = sshll.u32 (!%p212_p10), %s732_s15, 4  ;;  %s656_s16 = int_to_ptr.vmem [resolvable:$false] %s655_s16 }
  0x14   : > { %v729_v0 = vmov 0.0   ;;  %v730_v1 = vmov 0   ;;  %v257_v2 = vld [vmem:[%s876_s2] sm:$0xff]  ;;  %s245_s9 = scalar_select %p244_p11, %s719_s21, 1  ;;  %vm269_vm0 = vcmask 1043456   ;;  %vm265_vm1 = vcmask 31744  }
  0x15   : > { %338 = vmatprep.mubr.f32.mxu0 %v729_v0  ;;  %648 = vset.pattern.permute.xlu0 %v730_v1  ;;  %v256_v5 = vld [vmem:[%s875_s1] sm:$0xff]  ;;  %vm381_vm2 = vcmask 64512   ;;  %v731_v16 = vmov 839922192   ;;  %v471_v18 = vlaneseq  ;;  %s657_s21 = scalar_lea.vmem %s656_s16, 256 }
  0x16   : > { %260 = vperm.xlu0 %648, %v257_v2   ;;  %449 = vmatprep.mubr.f32.mxu1 %v729_v0  ;;  %s588_s10 = sshll.u32 %s245_s9, 3  ;;  %v348_v6 = vld [vmem:[%s877_s3] sm:$0xff]  ;;  %v469_v17 = vunpack.c.l.s4 %v731_v16  ;;  %s495_s9 = sshll.u32 %s242_s8, 4  ;;  %s496_s9 = int_to_ptr.vmem [resolvable:$true] %s495_s9 }
  0x17   : > { %649 = vset.pattern.permute.xlu1 %v730_v1  ;;  %s251_s13 = scalar_lea.vmem %s874_s0, %s588_s10  ;;  %v463_v7 = vld [vmem:[%s878_s4] sm:$0xf]  ;;  %v472_v20 = vshrl.u32 %v471_v18, 7  ;;  %s651_s14 = scalar_lea.vmem %s496_s9, 128 }
  0x18   : > { %v254_v3 = vld [vmem:[%s251_s13] sm:$0xff]  ;;  %466 = vperm.xlu1 %649, %v463_v7   ;;  %v470_v19 = vunpack.c.0.s8 %v469_v17  ;;  %s479_s13 = scalar_lea.sflag [#allocation4], %s240_s27  ;;  %p652_p12 = scmp.ne.s32.totalorder %s496_s9, %s651_s14 }
  0x19   : > { %v264_v4 = vcombine.high %v254_v3, %v254_v3  ;;  %p658_p1 = scmp.lt.s32.totalorder %s496_s9, %s656_s16  ;;  %p659_p2 = scmp.lt.s32.totalorder %s657_s21, %s651_s14 }
  0x1a   : > { %v473_v21 = vsub.s32 %v470_v19, %v472_v20  ;;  %p653_p13 = pnand %p652_p12, %p803_p4 }
  0x1b   : > { %579 = vmatprep.subr.msk.mxu0 %vm269_vm0, %v264_v4  ;;  %p660_p3 = por %p659_p2, %p658_p1 }
  0x1c   : > { %580 = vmatpush1.msk.msra.mxu0 %vm269_vm0, %v254_v3  ;;  %p654_p0 = pneg %p653_p13 }
  0x1d   : > { %581 = vmatmul.mubr.msk.f32.vlgmr.msra.gmra.mxu0 %vm265_vm1, %v256_v5 }
  0x1e   : > { %p661_p5 = pnand %p660_p3, %p654_p0 }
  0x34   : > { %349 = vxpose.xlu0.b32.start.end [1/1] (short) (narrow) %v348_v6, 8 }
  0x91   : > { %v261_v9 = vpop.permute.xlu0 %260 }
  0x93   : > { %v467_v22 = vpop.permute.xlu1 %466 }
  0x94   : > { %v474_v24 = vrot.slane %v467_v22, %v473_v21 }
  0xb0   : > { %v365_v15 = vpop.trf.xlu0 }
  0xdd   : > { %v340_v8 = vpop.f32.mrf.mxu0 }
  0xde   : > { %v341_v10 = vadd.f32 %v340_v8, %v261_v9 }
  0xdf   : > { %v342_v11 = vpop.f32.mrf.mxu0 }
  0xe0   : > { %v343_v12 = vadd.f32 %v342_v11, %v261_v9  ;;  %v345_v14 = vmax.f32 %v341_v10, 0.0 }
  0xe2   : > { %v346_v13 = vmax.f32 %v343_v12, 0.0 }
  0xe4   : > { %415 = vmatprep.subr.mxu1 %v346_v13 }
  0xe5   : > { %416 = vmatpush1.msra.mxu1 %v345_v14 }
  0xe6   : > { %582 = vmatmul.mubr.msk.f32.vlgmr.msra.gmra.mxu1 %vm381_vm2, %v365_v15 }
 0x1a6   : > { %v451_v23 = vpop.f32.mrf.mxu1 }
 0x1a8   : > { %v453_v25 = vpop.f32.mrf.mxu1 }
 0x1a9   : > { %v458_v26 = vcombine.low %v451_v23, %v453_v25 }
 0x1ab   : > { %v476_v27 = vadd.f32 %v474_v24, %v458_v26 }
 0x1ad   : > { %477 = vst [vmem:[%s242_s8] sm:$0xff] %v476_v27 }
 0x1ae   : > { %664 = shalt.err (!%p661_p5)
}
 0x1af   : > { %s665_s17 = scalar_lea.hbm %s493_s12, 128  ;;  %s669_s27 = scalar_lea.hbm %s879_s5, 256 }
 0x1b0   : > { %p666_p6 = scmp.ne.s32.totalorder %s493_s12, %s665_s17  ;;  %p670_p10 = scmp.lt.s32.totalorder %s493_s12, %s879_s5 }
 0x1b1   : > { %p671_p11 = scmp.lt.s32.totalorder %s669_s27, %s665_s17 }
 0x1b2   : > { %p667_p7 = pnand %p666_p6, %p803_p4 }
 0x1b3   : > { %p672_p12 = por %p671_p11, %p670_p10 }
 0x1b4   : > { %p668_p9 = pneg %p667_p7 }
 0x1b6   : > { %p673_p13 = pnand %p672_p12, %p668_p9 }
 0x1b8   : > { %676 = shalt.err (!%p673_p13)
}
 0x1b9   : > { %590 = dma.vmem_to_hbm [thread:$0]  (%p803_p4), %s496_s9, 128, %s493_s12, %s479_s13  }
 0x1ba PF: > { %p596_p0 = scmp.ge.s32.totalorder %s727_s23, 2  ;;  %s507_s8 = sand.u32 1, %s707_s18  }
 0x1bb   : > { %s508_s10 = scalar_lea.sflag [#allocation4], %s507_s8 }
 0x1bc   : > { %p593_p1 = pnand %p596_p0, %p810_p8 }
 0x1be   : > { %p594_p2 = pneg %p593_p1 }
 0x1c0   : > { %702 = dma.done.wait (%p594_p2), %s508_s10, 128  }
 0x1c1   : > { %704 = vsyncadd (%p594_p2), %s508_s10, 4294967168  ;;  %s18_s23 = sadd.s32 1, %s727_s23   ;;  %s882_s18 = smov %s711_s19 }
 0x1c2   : > { %p15_p3 = scmp.ge.s32.totalorder %s18_s23, 4   ;;  %s883_s19 = smov %s715_s20 }
 0x1c3   : > { %s884_s20 = smov %s816_s6  ;;  %s885_s21 = smov %s723_s22 }
 0x1c4   : > { %s886_s22 = smov %s888_s26  ;;  %17 = sbr.rel (!%p15_p3) target bundleno = 4 (0x4), region = 75 }
 0x1c9   :  { %513 = vsyncpa [#allocation4], 1 }
 0x1ca   :  { %515 = vsyncpa [#allocation4 + $0x1], 1 }

// kernel: tpu_custom_call.1
= control target key start
LH: loop header
LB: loop body
LE: loop exit
PB: predicated region body
PF: predicated region fallthrough
CT: control target
= control target key end

     0   :  { %10 = vsyncpa [#allocation4], 0  ;;  %s874_s0 = inlined_call_operand.vmem [shape: f32[2,4,256], index: 0, kind: input, shape index: {}]   ;;  %s875_s1 = inlined_call_operand.vmem [shape: f32[8,4], index: 1, kind: input, shape index: {}]   ;;  %s876_s2 = inlined_call_operand.vmem [shape: f32[8,1], index: 2, kind: input, shape index: {}]   ;;  %s877_s3 = inlined_call_operand.vmem [shape: f32[8,4], index: 3, kind: input, shape index: {}]   ;;  %s878_s4 = inlined_call_operand.vmem [shape: f32[4,1], index: 4, kind: input, shape index: {}]   ;;  %s879_s5 = inlined_call_operand.hbm [shape: f32[2,4,256], index: 5, kind: output, shape index: {}]  }
   0x1   :  { %12 = vsyncpa [#allocation4 + $0x1], 0  ;;  %s763_s18 = smov 0   ;;  %s765_s19 = smov 0  }
   0x2   :  { %s767_s20 = smov 0   ;;  %s769_s21 = smov 0  }
   0x3   :  { %s771_s22 = smov 0   ;;  %s773_s23 = smov 0  }
   0x4 LB: > { %s571_s24 = sadd.s32 4294967295, %s727_s23   ;;  %s572_s25 = sadd.s32 4294967294, %s727_s23   ;;  %s727_s23 = sphi %s773_s23, %s18_s23   ;;  %s723_s22 = sphi %s771_s22, %s886_s22   ;;  %s719_s21 = sphi %s769_s21, %s885_s21   ;;  %s715_s20 = sphi %s767_s20, %s884_s20   ;;  %s711_s19 = sphi %s765_s19, %s883_s19   ;;  %s707_s18 = sphi %s763_s18, %s882_s18  }
   0x5   : > { %s27_s26 = sadd.s32 1, %s723_s22  ;;  %s151_s27 = sadd.s32 1, %s715_s20 }
   0x6   : > { %p28_p0 = scmp.ge.s32.totalorder %s27_s26, 2  ;;  %p161_p1 = scmp.ne.s32.totalorder %s715_s20, %s711_s19 }
   0x7   : > { %p162_p2 = scmp.eq.s32.totalorder %s571_s24, 1  ;;  %p167_p3 = scmp.ne.s32.totalorder %s711_s19, %s707_s18 }
   0x8   : > { %s888_s26 = smov (%p28_p0, %s27_s26), 0  ;;  %p168_p5 = scmp.eq.s32.totalorder %s572_s25, 1 }
   0x9   : > { %p803_p4 = por %p162_p2, %p161_p1  ;;  %s146_s29 = ssub.s32 %s723_s22, %s888_s26 }
   0xa   : > { %p575_p6 = scmp.ge.s32.totalorder %s727_s23, 1  ;;  %p149_p7 = scmp.eq.s32.totalorder %s146_s29, 0 }
   0xb   : > { %p810_p8 = por %p168_p5, %p167_p3  ;;  %p211_p9 = scmp.lt.s32.totalorder %s727_s23, 3 }
   0xc   : > { %s816_s6 = scalar_select %p149_p7, %s715_s20, %s151_s27  }
   0xd   : > { %p212_p10 = pnand %p575_p6, %p211_p9 }
   0xe   : > { %p244_p11 = scmp.lt.s32.totalorder (!%p212_p10), %s719_s21, 1  ;;  %s240_s27 = sand.u32 (!%p212_p10), 1, %s711_s19  }
   0xf   : > { %215 = sbr.rel (%p212_p10) target bundleno = 442 (0x1ba), region = 40  ;;  %s576_s29 = sshll.u32 (!%p212_p10), %s240_s27, 3 }
  0x10   : > { %s589_s7 = sshll.u32 (!%p212_p10), %s719_s21, 7  ;;  %s242_s8 = scalar_lea.vmem (!%p212_p10), [#allocation3], %s576_s29 }
  0x11   : > { %s493_s12 = scalar_lea.hbm (!%p212_p10), %s879_s5, %s589_s7  ;;  %s732_s15 = smov (!%p212_p10), [#allocation3]  }
  0x12   : > { %s655_s16 = sshll.u32 (!%p212_p10), %s732_s15, 4  ;;  %s656_s16 = int_to_ptr.vmem [resolvable:$false] %s655_s16 }
  0x14   : > { %v729_v0 = vmov 0.0   ;;  %v730_v1 = vmov 0   ;;  %v257_v2 = vld [vmem:[%s876_s2] sm:$0xff]  ;;  %s245_s9 = scalar_select %p244_p11, %s719_s21, 1  ;;  %vm269_vm0 = vcmask 1043456   ;;  %vm265_vm1 = vcmask 31744  }
  0x15   : > { %338 = vmatprep.mubr.f32.mxu0 %v729_v0  ;;  %648 = vset.pattern.permute.xlu0 %v730_v1  ;;  %v256_v5 = vld [vmem:[%s875_s1] sm:$0xff]  ;;  %vm381_vm2 = vcmask 64512   ;;  %v731_v16 = vmov 839922192   ;;  %v471_v18 = vlaneseq  ;;  %s657_s21 = scalar_lea.vmem %s656_s16, 256 }
  0x16   : > { %260 = vperm.xlu0 %648, %v257_v2   ;;  %449 = vmatprep.mubr.f32.mxu1 %v729_v0  ;;  %s588_s10 = sshll.u32 %s245_s9, 3  ;;  %v348_v6 = vld [vmem:[%s877_s3] sm:$0xff]  ;;  %v469_v17 = vunpack.c.l.s4 %v731_v16  ;;  %s495_s9 = sshll.u32 %s242_s8, 4  ;;  %s496_s9 = int_to_ptr.vmem [resolvable:$true] %s495_s9 }
  0x17   : > { %649 = vset.pattern.permute.xlu1 %v730_v1  ;;  %s251_s13 = scalar_lea.vmem %s874_s0, %s588_s10  ;;  %v463_v7 = vld [vmem:[%s878_s4] sm:$0xf]  ;;  %v472_v20 = vshrl.u32 %v471_v18, 7  ;;  %s651_s14 = scalar_lea.vmem %s496_s9, 128 }
  0x18   : > { %v254_v3 = vld [vmem:[%s251_s13] sm:$0xff]  ;;  %466 = vperm.xlu1 %649, %v463_v7   ;;  %v470_v19 = vunpack.c.0.s8 %v469_v17  ;;  %s479_s13 = scalar_lea.sflag [#allocation4], %s240_s27  ;;  %p652_p12 = scmp.ne.s32.totalorder %s496_s9, %s651_s14 }
  0x19   : > { %v264_v4 = vcombine.high %v254_v3, %v254_v3  ;;  %p658_p1 = scmp.lt.s32.totalorder %s496_s9, %s656_s16  ;;  %p659_p2 = scmp.lt.s32.totalorder %s657_s21, %s651_s14 }
  0x1a   : > { %v473_v21 = vsub.s32 %v470_v19, %v472_v20  ;;  %p653_p13 = pnand %p652_p12, %p803_p4 }
  0x1b   : > { %579 = vmatprep.subr.msk.mxu0 %vm269_vm0, %v264_v4  ;;  %p660_p3 = por %p659_p2, %p658_p1 }
  0x1c   : > { %580 = vmatpush1.msk.msra.mxu0 %vm269_vm0, %v254_v3  ;;  %p654_p0 = pneg %p653_p13 }
  0x1d   : > { %581 = vmatmul.mubr.msk.f32.vlgmr.msra.gmra.mxu0 %vm265_vm1, %v256_v5 }
  0x1e   : > { %p661_p5 = pnand %p660_p3, %p654_p0 }
  0x34   : > { %349 = vxpose.xlu0.b32.start.end [1/1] (short) (narrow) %v348_v6, 8 }
  0x91   : > { %v261_v9 = vpop.permute.xlu0 %260 }
  0x93   : > { %v467_v22 = vpop.permute.xlu1 %466 }
  0x94   : > { %v474_v24 = vrot.slane %v467_v22, %v473_v21 }
  0xb0   : > { %v365_v15 = vpop.trf.xlu0 }
  0xdd   : > { %v340_v8 = vpop.f32.mrf.mxu0 }
  0xde   : > { %v341_v10 = vadd.f32 %v340_v8, %v261_v9 }
  0xdf   : > { %v342_v11 = vpop.f32.mrf.mxu0 }
  0xe0   : > { %v343_v12 = vadd.f32 %v342_v11, %v261_v9  ;;  %v345_v14 = vmax.f32 %v341_v10, 0.0 }
  0xe2   : > { %v346_v13 = vmax.f32 %v343_v12, 0.0 }
  0xe4   : > { %415 = vmatprep.subr.mxu1 %v346_v13 }
  0xe5   : > { %416 = vmatpush1.msra.mxu1 %v345_v14 }
  0xe6   : > { %582 = vmatmul.mubr.msk.f32.vlgmr.msra.gmra.mxu1 %vm381_vm2, %v365_v15 }
 0x1a6   : > { %v451_v23 = vpop.f32.mrf.mxu1 }
 0x1a8   : > { %v453_v25 = vpop.f32.mrf.mxu1 }
 0x1a9   : > { %v458_v26 = vcombine.low %v451_v23, %v453_v25 }
 0x1ab   : > { %v476_v27 = vadd.f32 %v474_v24, %v458_v26 }
 0x1ad   : > { %477 = vst [vmem:[%s242_s8] sm:$0xff] %v476_v27 }
 0x1ae   : > { %664 = shalt.err (!%p661_p5)
}
 0x1af   : > { %s665_s17 = scalar_lea.hbm %s493_s12, 128  ;;  %s669_s27 = scalar_lea.hbm %s879_s5, 256 }
 0x1b0   : > { %p666_p6 = scmp.ne.s32.totalorder %s493_s12, %s665_s17  ;;  %p670_p10 = scmp.lt.s32.totalorder %s493_s12, %s879_s5 }
 0x1b1   : > { %p671_p11 = scmp.lt.s32.totalorder %s669_s27, %s665_s17 }
 0x1b2   : > { %p667_p7 = pnand %p666_p6, %p803_p4 }
 0x1b3   : > { %p672_p12 = por %p671_p11, %p670_p10 }
 0x1b4   : > { %p668_p9 = pneg %p667_p7 }
 0x1b6   : > { %p673_p13 = pnand %p672_p12, %p668_p9 }
 0x1b8   : > { %676 = shalt.err (!%p673_p13)
}
 0x1b9   : > { %590 = dma.vmem_to_hbm [thread:$0]  (%p803_p4), %s496_s9, 128, %s493_s12, %s479_s13  }
 0x1ba PF: > { %p596_p0 = scmp.ge.s32.totalorder %s727_s23, 2  ;;  %s507_s8 = sand.u32 1, %s707_s18  }
 0x1bb   : > { %s508_s10 = scalar_lea.sflag [#allocation4], %s507_s8 }
 0x1bc   : > { %p593_p1 = pnand %p596_p0, %p810_p8 }
 0x1be   : > { %p594_p2 = pneg %p593_p1 }
 0x1c0   : > { %702 = dma.done.wait (%p594_p2), %s508_s10, 128  }
 0x1c1   : > { %704 = vsyncadd (%p594_p2), %s508_s10, 4294967168  ;;  %s18_s23 = sadd.s32 1, %s727_s23   ;;  %s882_s18 = smov %s711_s19 }
 0x1c2   : > { %p15_p3 = scmp.ge.s32.totalorder %s18_s23, 4   ;;  %s883_s19 = smov %s715_s20 }
 0x1c3   : > { %s884_s20 = smov %s816_s6  ;;  %s885_s21 = smov %s723_s22 }
 0x1c4   : > { %s886_s22 = smov %s888_s26  ;;  %17 = sbr.rel (!%p15_p3) target bundleno = 4 (0x4), region = 75 }
 0x1c9   :  { %513 = vsyncpa [#allocation4], 1 }
 0x1ca   :  { %515 = vsyncpa [#allocation4 + $0x1], 1 }

</bundles_post_ra>
